<compile_context>
chip_gen: v5e
topology: v5e:2x2
jax: 0.10.0
libtpu: 0.0.40
codegen_flags: <defaults>
</compile_context>

<pallas_src>
import functools

import jax
import jax.numpy as jnp
from jax.experimental import pallas as pl
from jax.experimental.pallas import tpu as pltpu


def _round_up(a, b):
    return (a + b - 1) // b * b


# ----------------------------------------------------------------------------
# Kernels
# ----------------------------------------------------------------------------
def _small_kernel(x_ref, w_ref, b_ref, o_ref):
    # x_ref: (B, K), w_ref: (K, N), b_ref: (1, N), o_ref: (B, N) -- all in VMEM.
    acc = jnp.dot(x_ref[...], w_ref[...], preferred_element_type=jnp.float32)
    o_ref[...] = jax.nn.sigmoid(acc + b_ref[...]).astype(o_ref.dtype)


def _tiled_kernel(x_ref, w_ref, b_ref, o_ref, acc_ref):
    # x_ref:   (tm, tk)  activation tile
    # w_ref:   (tk, tn)  weight tile, already transposed to (K, N) offline
    # b_ref:   (1, tn)   bias row tile
    # o_ref:   (tm, tn)  output tile (resident across the K grid axis)
    # acc_ref: (tm, tn)  f32 accumulator scratch (VMEM)
    k = pl.program_id(2)

    @pl.when(k == 0)
    def _():
        acc_ref[...] = jnp.zeros_like(acc_ref)

    acc_ref[...] += jnp.dot(
        x_ref[...], w_ref[...], preferred_element_type=jnp.float32
    )

    @pl.when(k == pl.num_programs(2) - 1)
    def _():
        # f32 epilogue: bias add + sigmoid, single cast on store.
        o_ref[...] = jax.nn.sigmoid(acc_ref[...] + b_ref[...]).astype(o_ref.dtype)


# ----------------------------------------------------------------------------
# Tile selection / one-time parameter prep
# ----------------------------------------------------------------------------
# Single-block fast path if padded f32 operands fit in this budget.
_SMALL_VMEM_BUDGET_BYTES = 2 * 1024 * 1024


def _is_small(B, K, N):
    def pad_bytes(r, c):
        return 4 * _round_up(r, 8) * _round_up(c, 128)

    total = pad_bytes(B, K) + pad_bytes(K, N) + pad_bytes(B, N) + pad_bytes(1, N)
    return total <= _SMALL_VMEM_BUDGET_BYTES


def _pick_tiles(B, K, N):
    # 256-wide MXU friendly tiles (v6e/v7x); lane-dense output; few K steps.
    tm = 512 if B >= 512 else min(256, _round_up(B, 8))
    tn = 256 if N > 128 else 128
    tk = min(2048, _round_up(K, 128))
    return tm, tn, tk


def prepare_params(weight, bias, *, tn=None, tk=None):
    """One-time parameter prep (hoist out of the per-call forward path).

    weight: (N, K) PyTorch nn.Linear layout -> returned as (K, N) (+padding).
    bias:   (N,) -> (1, N) row (+padding).
    """
    weight = jnp.asarray(weight)
    bias = jnp.asarray(bias)
    N, K = weight.shape
    w_t = weight.T                       # (K, N): standard MXU contraction
    b_row = bias.reshape(1, N)
    if tn is None or tk is None:         # small / single-block path: no padding
        return w_t, b_row
    Kp, Np = _round_up(K, tk), _round_up(N, tn)
    if (Kp, Np) != (K, N):
        w_t = jnp.pad(w_t, ((0, Kp - K), (0, Np - N)))
        b_row = jnp.pad(b_row, ((0, 0), (0, Np - N)))
    return w_t, b_row


# ----------------------------------------------------------------------------
# Jitted forward passes
# ----------------------------------------------------------------------------
@jax.jit
def linear_sigmoid_small(x, w_t, b_row):
    """Single-block path: whole problem lives in VMEM, grid=()."""
    B, _ = x.shape
    N = w_t.shape[1]
    vmem = pl.BlockSpec(memory_space=pltpu.MemorySpace.VMEM)
    return pl.pallas_call(
        _small_kernel,
        out_shape=jax.ShapeDtypeStruct((B, N), x.dtype),
        in_specs=[vmem, vmem, vmem],
        out_specs=vmem,
    )(x, w_t, b_row)


@functools.partial(jax.jit, static_argnames=("n_out", "tm", "tn", "tk"))
def linear_sigmoid_tiled(x, w_t, b_row, *, n_out, tm, tn, tk):
    """Tiled path. w_t/b_row must come from prepare_params(..., tn=tn, tk=tk)."""
    B, K = x.shape
    Kp, Np = w_t.shape
    Bp = _round_up(B, tm)
    # Only the activation may need per-call padding (params were padded once).
    if (Bp, Kp) != (B, K):
        x = jnp.pad(x, ((0, Bp - B), (0, Kp - K)))

    grid = (Bp // tm, Np // tn, Kp // tk)

    out = pl.pallas_call(
        _tiled_kernel,
        out_shape=jax.ShapeDtypeStruct((Bp, Np), x.dtype),
        grid=grid,
        in_specs=[
            pl.BlockSpec((tm, tk), lambda i, j, k: (i, k)),   # x tile
            pl.BlockSpec((tk, tn), lambda i, j, k: (k, j)),   # weight tile (K,N)
            pl.BlockSpec((1, tn), lambda i, j, k: (0, j)),    # bias tile
        ],
        out_specs=pl.BlockSpec((tm, tn), lambda i, j, k: (i, j)),
        scratch_shapes=[pltpu.VMEM((tm, tn), jnp.float32)],
        compiler_params=pltpu.CompilerParams(
            dimension_semantics=("parallel", "parallel", "arbitrary"),
            # ~14 MiB of tiles at the largest defaults; 48 MiB limit is within
            # v7x's 64 MiB physical VMEM and unlocks big tiles on v5e (16 MiB
            # default scoped limit).
            vmem_limit_bytes=48 * 1024 * 1024,
        ),
    )(x, w_t, b_row)

    return out[:B, :n_out]


def linear_sigmoid(x, weight, bias):
    """Convenience one-shot wrapper. In production, call prepare_params once
    at load time and call linear_sigmoid_small / linear_sigmoid_tiled directly."""
    B, K = x.shape
    N = weight.shape[0]
    if _is_small(B, K, N):
        w_t, b_row = prepare_params(weight, bias)
        return linear_sigmoid_small(x, w_t, b_row)
    tm, tn, tk = _pick_tiles(B, K, N)
    w_t, b_row = prepare_params(weight, bias, tn=tn, tk=tk)
    return linear_sigmoid_tiled(x, w_t, b_row, n_out=N, tm=tm, tn=tn, tk=tk)


if __name__ == "__main__":
    # Shapes consistent with the module: input_size=32, output_size=16, batch=8
    batch, input_size, output_size = 8, 32, 16

    key = jax.random.PRNGKey(0)
    kx, kw, kb = jax.random.split(key, 3)

    x = jax.random.normal(kx, (batch, input_size), dtype=jnp.float32)
    bound = 1.0 / jnp.sqrt(jnp.float32(input_size))
    weight = jax.random.uniform(kw, (output_size, input_size),
                                minval=-bound, maxval=bound, dtype=jnp.float32)
    bias = jax.random.uniform(kb, (output_size,),
                              minval=-bound, maxval=bound, dtype=jnp.float32)

    # Fast path (single VMEM block, no grid), with params prepared once.
    w_t, b_row = prepare_params(weight, bias)
    out = linear_sigmoid_small(x, w_t, b_row)
    jax.block_until_ready(out)

    ref = jax.nn.sigmoid(x @ weight.T + bias)
    assert out.shape == (batch, output_size)
    assert jnp.allclose(out, ref, atol=1e-5, rtol=1e-5)

    # Dispatcher should pick the same fast path and match too.
    out_d = linear_sigmoid(x, weight, bias)
    jax.block_until_ready(out_d)
    assert jnp.allclose(out_d, ref, atol=1e-5, rtol=1e-5)

    # Larger shape to exercise the tiled multi-block path
    # (tm=512, tn=256, tk=2048 -> grid=(1, 3, 2), padded N 640->768).
    k2 = jax.random.PRNGKey(1)
    k2x, k2w, k2b = jax.random.split(k2, 3)
    B2, K2, N2 = 512, 4096, 640
    x2 = jax.random.normal(k2x, (B2, K2), dtype=jnp.float32)
    w2 = jax.random.normal(k2w, (N2, K2), dtype=jnp.float32) * 0.02
    b2 = jax.random.normal(k2b, (N2,), dtype=jnp.float32)

    tm, tn, tk = _pick_tiles(B2, K2, N2)
    w2_t, b2_row = prepare_params(w2, b2, tn=tn, tk=tk)   # one-time prep
    out2 = linear_sigmoid_tiled(x2, w2_t, b2_row, n_out=N2, tm=tm, tn=tn, tk=tk)
    jax.block_until_ready(out2)

    ref2 = jax.nn.sigmoid(x2 @ w2.T + b2)
    assert out2.shape == (B2, N2)
    assert jnp.allclose(out2, ref2, atol=1e-4, rtol=1e-4)

    print("KERNEL_OK")
</pallas_src>

<mosaic_0001>
module attributes {stable_mosaic.version = 11 : i64} {
  func.func @_small_kernel(%arg0: memref<8x32xf32, #tpu.memory_space<vmem>>, %arg1: memref<32x16xf32, #tpu.memory_space<vmem>>, %arg2: memref<1x16xf32, #tpu.memory_space<vmem>>, %arg3: memref<8x16xf32, #tpu.memory_space<vmem>>) attributes {dimension_semantics = [], scalar_prefetch = 0 : i64, scratch_operands = 0 : i64, tpu.core_type = #tpu.core_type<tc>} {
    %c0 = arith.constant 0 : index
    %c0_0 = arith.constant 0 : index
    %0 = vector.load %arg0[%c0, %c0_0] : memref<8x32xf32, #tpu.memory_space<vmem>>, vector<8x32xf32>
    %c0_1 = arith.constant 0 : index
    %c0_2 = arith.constant 0 : index
    %1 = vector.load %arg1[%c0_1, %c0_2] : memref<32x16xf32, #tpu.memory_space<vmem>>, vector<32x16xf32>
    %cst = arith.constant dense<0.000000e+00> : vector<8x16xf32>
    %2 = tpu.matmul %0, %1, %cst {dimension_numbers = #tpu.dot_dimension_numbers<[1], [0], [0], [1], [0, 0, 1, 1], [], []>} : vector<8x32xf32>, vector<32x16xf32>, vector<8x16xf32> -> vector<8x16xf32>
    %c0_3 = arith.constant 0 : index
    %c0_4 = arith.constant 0 : index
    %3 = vector.load %arg2[%c0_3, %c0_4] : memref<1x16xf32, #tpu.memory_space<vmem>>, vector<1x16xf32>
    %4 = vector.broadcast %3 : vector<1x16xf32> to vector<8x16xf32>
    %5 = arith.addf %2, %4 : vector<8x16xf32>
    %6 = arith.negf %5 : vector<8x16xf32>
    %7 = math.exp %6 : vector<8x16xf32>
    %cst_5 = arith.constant 1.000000e+00 : f32
    %8 = vector.broadcast %cst_5 : f32 to vector<8x16xf32>
    %9 = arith.addf %8, %7 : vector<8x16xf32>
    %10 = arith.divf %8, %9 : vector<8x16xf32>
    %c0_6 = arith.constant 0 : index
    %c0_7 = arith.constant 0 : index
    %11 = vector.load %arg3[%c0_6, %c0_7] : memref<8x16xf32, #tpu.memory_space<vmem>>, vector<8x16xf32>
    tpu.vector_store %arg3[%c0_6, %c0_7], %10 {strides = array<i32>} : memref<8x16xf32, #tpu.memory_space<vmem>>, vector<8x16xf32>,
    return
  }
}

</mosaic_0001>

<bundles_post_ra>
// kernel: linear_sigmoid_small.1
= control target key start
LH: loop header
LB: loop body
LE: loop exit
PB: predicated region body
PF: predicated region fallthrough
CT: control target
= control target key end

     0   :  { %s161_s0 = inlined_call_operand.vmem [shape: f32[8,32], index: 0, kind: input, shape index: {}]   ;;  %s162_s1 = inlined_call_operand.vmem [shape: f32[32,16], index: 1, kind: input, shape index: {}]   ;;  %s163_s2 = inlined_call_operand.vmem [shape: f32[1,16], index: 2, kind: input, shape index: {}]   ;;  %s164_s3 = inlined_call_operand.hbm [shape: f32[8,16], index: 3, kind: output, shape index: {}]  }
   0x1   :  { %v19_v0 = vld [vmem:[%s162_s1 + $0x18] sm:$0xff]  ;;  %v18_v1 = vld [vmem:[%s162_s1 + $0x10] sm:$0xff]  ;;  %v17_v2 = vld [vmem:[%s162_s1 + $0x8] sm:$0xff] }
   0x2   :  { %40 = vmatpush.msra.mxu0 %v19_v0 }
   0x3   :  { %8 = vsyncpa [#allocation3], 0  ;;  %v16_v3 = vld [vmem:[%s162_s1] sm:$0xff]  ;;  %vm24_vm0 = vcmask 261120   ;;  %vm67_vm4 = vcmask 130048  }
   0x4   :  { %41 = vmatpush.msra.mxu0 %v18_v1  ;;  %v15_v4 = vld [vmem:[%s161_s0] sm:$0xff]  ;;  %s119_s0 = smov [#allocation2]  }
   0x5   :  { %v88_v5 = vld [vmem:[%s163_s2] ss:$0 sm:$0xff]  ;;  %s74_s1 = sshll.u32 %s119_s0, 4  ;;  %s76_s2 = sshll.u32 %s164_s3, 4  ;;  %s75_s1 = int_to_ptr.vmem [resolvable:$true] %s74_s1  ;;  %s77_s2 = int_to_ptr.hbm [resolvable:$true] %s76_s2 }
   0x6   :  { %42 = vmatpush.msra.mxu0 %v17_v2 }
   0x8   :  { %43 = vmatpush.msra.mxu0 %v16_v3 }
   0x9   :  { %85 = vmatmul.msk.f32.vlgmr.msra.gmra.mxu0 %vm24_vm0, %v15_v4 }
  0x86   :  { %v45_v6 = vpop.f32.mrf.mxu0 }
  0x87   :  { %v46_v7 = vadd.f32 %v88_v5, %v45_v6 }
  0x89   :  { %v86_v8 = vmul.f32 -1.442695, %v46_v7 }
  0x8b   :  { %89 = vpow2.f32 %v86_v8 }
  0x91   :  { %v90_v9 = vpop.eup %89 }
  0x92   :  { %v51_v10 = vadd.f32 1.0, %v90_v9 }
  0x94   :  { %91 = vrcp.f32 %v51_v10  ;;  %v63_v14 = vand.u32 2147483648, %v51_v10  ;;  %v61_v16 = vand.u32 2147483647, %v51_v10  ;;  %vm57_vm2 = vweird.f32 %v51_v10 }
  0x96   :  { %v64_v18 = vor.u32 1.1754944e-38, %v63_v14  ;;  %vm62_vm5 = vcmp.eq.f32.partialorder %v61_v16, 8.507059e+37 }
  0x9a   :  { %v92_v11 = vpop.eup %91 }
  0x9b   :  { %v53_v12 = vmul.f32 %v92_v11, %v51_v10  ;;  %vm58_vm1 = vweird.f32 %v92_v11 }
  0x9c   :  { %vm59_vm3 = vmor %vm57_vm2, %vm58_vm1 }
  0x9d   :  { %v54_v13 = vsub.f32 1.0, %v53_v12 }
  0x9f   :  { %v55_v15 = vmul.f32 %v92_v11, %v54_v13 }
  0xa1   :  { %v56_v17 = vadd.f32 %v92_v11, %v55_v15 }
  0xa3   :  { %v60_v19 = vsel %vm59_vm3, %v92_v11, %v56_v17 }
  0xa4   :  { %v65_v20 = vsel %vm62_vm5, %v64_v18, %v60_v19 }
  0xa5   :  { %68 = vst.msk [vmem:[#allocation2] sm:$0xff] %vm67_vm4, %v65_v20 }
  0xa6   :  { %79 = dma.vmem_to_hbm [thread:$0]  %s75_s1, 128, %s77_s2, [#allocation3]  }
  0xa7   :  { %117 = dma.done.wait [#allocation3], 128  }
  0xa8   :  { %118 = vsyncadd [#allocation3], 4294967168 }
  0xa9   :  { %84 = vsyncpa [#allocation3], 1 }

</bundles_post_ra>
